<compile_context>
chip_gen: v6e
topology: v6e:2x2x1
jax: 0.10.0
libtpu: 0.0.40
codegen_flags: <defaults>
</compile_context>

<pallas_src>
import math

import jax
import jax.numpy as jnp
from jax.experimental import pallas as pl
from jax.experimental.pallas import tpu as pltpu

EPS = 1e-8
LANE = 128
SUBLANE = 8

# MXU input dtype for the refine-kernel matmuls (DFT / filter-mix / inverse-DFT).
# Accumulation is always f32 (preferred_element_type).  Set to jnp.bfloat16 on
# v6e/v7x for ~2x MXU throughput; float32 keeps bit-faithful semantics.
MXU_DTYPE = jnp.float32

# Scoped-VMEM limit: above the 16/32 MiB defaults, below v7x's 64 MiB physical.
_VMEM_LIMIT = 48 * 1024 * 1024


def _round_up(x, m):
    return (x + m - 1) // m * m


def _choose_row_tile(n_rows, per_row_bytes, budget_bytes=12 * 1024 * 1024,
                     max_rows=256):
    """Row (B*C) tile: multiple of 8 sublanes, sized so double-buffered blocks
    stay comfortably inside scoped VMEM on every TPU generation (incl. v7x)."""
    tr = min(_round_up(max(n_rows, SUBLANE), SUBLANE), max_rows)
    while tr > SUBLANE and 2 * tr * per_row_bytes > budget_bytes:
        tr = max(SUBLANE, _round_up(tr // 2, SUBLANE))
    return tr


# ----------------------------------------------------------------------------
# Kernel 1: instance norm over time + backbone linear (seq_len -> pred_len)
# ----------------------------------------------------------------------------
def backbone_kernel(x_ref, wt_ref, b_ref, xn_ref, mu_ref, norm_ref, y_ref):
    x = x_ref[...]                                        # [TR, L]
    L = x.shape[-1]
    mu = jnp.mean(x, axis=-1, keepdims=True)              # [TR, 1]
    xc = x - mu
    var = jnp.sum(xc * xc, axis=-1, keepdims=True) / (L - 1)   # unbiased (torch.std)
    norm = jnp.sqrt(var) + EPS
    xn = xc / norm
    xn_ref[...] = xn
    mu_ref[...] = mu
    norm_ref[...] = norm
    # y_hat = _x @ W^T + b   (W padded to a lane-dense pred_len)
    y_ref[...] = (jnp.dot(xn, wt_ref[...], preferred_element_type=jnp.float32)
                  + b_ref[...])


# ----------------------------------------------------------------------------
# Kernel 2: LeadRefiner frequency-domain refinement + de-normalization
# ----------------------------------------------------------------------------
def refine_kernel(y_ref, seq_ref, p_ref, mu_ref, norm_ref,
                  d2_ref, state_ref, wmix_ref, bmix_ref, idft_ref, out_ref):
    TR, Hp = y_ref.shape
    K = seq_ref.shape[0]
    Fp = d2_ref.shape[1] // 2
    wdt = d2_ref.dtype                      # MXU input dtype (f32 or bf16)

    y = y_ref[...]                                            # [TR, Hp] (f32)
    seq = seq_ref[...].reshape(K * TR, Hp)                    # [K*TR, Hp]
    d2 = d2_ref[...]                                          # [Hp, 2Fp] = [DC|-DS]

    # rfft of y_hat (1 matmul) and of ALL K shifted leaders (1 batched matmul)
    yf = jnp.dot(y.astype(wdt), d2, preferred_element_type=jnp.float32)   # [TR, 2Fp]
    sf = jnp.dot(seq.astype(wdt), d2, preferred_element_type=jnp.float32) # [K*TR, 2Fp]
    yf_re, yf_im = yf[:, :Fp], yf[:, Fp:]

    # complex filters from the state mixture (1 matmul; nothing streamed from HBM)
    filt = jnp.dot(p_ref[...].astype(wdt), state_ref[...],
                   preferred_element_type=jnp.float32)        # [TR, (2K+1)*2Fp]

    def f_re(slot):
        return filt[:, slot * 2 * Fp: slot * 2 * Fp + Fp]

    def f_im(slot):
        return filt[:, slot * 2 * Fp + Fp: (slot + 1) * 2 * Fp]

    # per-leader complex filtering (VPU); k = 0 peels the accumulator init
    ss_re = ss_im = sd_re = sd_im = None
    for k in range(K):                                        # static unroll
        s_re = sf[k * TR:(k + 1) * TR, :Fp]
        s_im = sf[k * TR:(k + 1) * TR, Fp:]
        f1r, f1i = f_re(k), f_im(k)
        a_re = s_re * f1r - s_im * f1i        # seq_shifted_f * filters[:, :K]
        a_im = s_re * f1i + s_im * f1r
        d_re = a_re - yf_re                   # (seq_shifted_f - y_hat_f)
        d_im = a_im - yf_im
        f2r, f2i = f_re(K + k), f_im(K + k)
        b_re = d_re * f2r - d_im * f2i        # ... * filters[:, K:-1]
        b_im = d_re * f2i + d_im * f2r
        if k == 0:
            ss_re, ss_im, sd_re, sd_im = a_re, a_im, b_re, b_im
        else:
            ss_re, ss_im = ss_re + a_re, ss_im + a_im
            sd_re, sd_im = sd_re + b_re, sd_im + b_im

    f3r, f3i = f_re(2 * K), f_im(2 * K)
    yh_re = yf_re * f3r - yf_im * f3i         # y_hat_f * filters[:, -1]
    yh_im = yf_re * f3i + yf_im * f3r

    # complex mix layer on cat([sum_k seq_shifted_f, sum_k seq_diff_f, y_hat_f])
    # collapsed to 2 matmuls against the pre-fused weight [3Fp, 2Fp] = [Wre|Wim]
    z_re = jnp.concatenate([ss_re, sd_re, yh_re], axis=-1).astype(wdt)  # [TR, 3Fp]
    z_im = jnp.concatenate([ss_im, sd_im, yh_im], axis=-1).astype(wdt)
    wmix = wmix_ref[...]
    mm_r = jnp.dot(z_re, wmix, preferred_element_type=jnp.float32)  # [rr | ri]
    mm_i = jnp.dot(z_im, wmix, preferred_element_type=jnp.float32)  # [ir | ii]
    bm = bmix_ref[...]                                              # [1, 2Fp]
    m_re = mm_r[:, :Fp] - mm_i[:, Fp:] + bm[:, :Fp]
    m_im = mm_r[:, Fp:] + mm_i[:, :Fp] + bm[:, Fp:]

    # irfft(mix, n=pred_len) as one matmul against the stacked [2Fp, Hp] matrix
    mcat = jnp.concatenate([m_re, m_im], axis=-1).astype(wdt)       # [TR, 2Fp]
    delta = jnp.dot(mcat, idft_ref[...], preferred_element_type=jnp.float32)

    # y_hat + refinement, then LightMTS de-normalization
    out_ref[...] = (y + delta) * norm_ref[...] + mu_ref[...]


# ----------------------------------------------------------------------------
# BlockSpec helpers
# ----------------------------------------------------------------------------
def _row_spec(shape):
    n_rest = len(shape) - 1
    return pl.BlockSpec(shape, lambda g, _n=n_rest: (g,) + (0,) * _n)


def _shared_spec(shape):
    nd = len(shape)
    return pl.BlockSpec(shape, lambda g, _n=nd: (0,) * _n)


# ----------------------------------------------------------------------------
# Pallas wrappers
# ----------------------------------------------------------------------------
def run_backbone(x_rows, Wt, b_row, tr):
    Rp, L = x_rows.shape
    Hp = Wt.shape[1]
    out_shape = (
        jax.ShapeDtypeStruct((Rp, L), jnp.float32),
        jax.ShapeDtypeStruct((Rp, 1), jnp.float32),
        jax.ShapeDtypeStruct((Rp, 1), jnp.float32),
        jax.ShapeDtypeStruct((Rp, Hp), jnp.float32),
    )
    return pl.pallas_call(
        backbone_kernel,
        out_shape=out_shape,
        grid=(Rp // tr,),
        in_specs=[
            _row_spec((tr, L)),
            _shared_spec((L, Hp)),
            _shared_spec((1, Hp)),
        ],
        out_specs=(
            _row_spec((tr, L)),
            _row_spec((tr, 1)),
            _row_spec((tr, 1)),
            _row_spec((tr, Hp)),
        ),
        compiler_params=pltpu.CompilerParams(
            dimension_semantics=("parallel",),
            vmem_limit_bytes=_VMEM_LIMIT),
    )(x_rows, Wt, b_row)


def run_refine(y_rows, seq_krh, p_rows, mu_rows, norm_rows, packed, tr):
    Rp, Hp = y_rows.shape
    K = seq_krh.shape[0]
    Sp = p_rows.shape[1]
    return pl.pallas_call(
        refine_kernel,
        out_shape=jax.ShapeDtypeStruct((Rp, Hp), jnp.float32),
        grid=(Rp // tr,),
        in_specs=[
            _row_spec((tr, Hp)),
            pl.BlockSpec((K, tr, Hp), lambda g: (0, g, 0)),
            _row_spec((tr, Sp)),
            _row_spec((tr, 1)),
            _row_spec((tr, 1)),
            _shared_spec(packed['D2'].shape),
            _shared_spec(packed['state_all'].shape),
            _shared_spec(packed['Wmix'].shape),
            _shared_spec(packed['bmix'].shape),
            _shared_spec(packed['IDFT'].shape),
        ],
        out_specs=_row_spec((tr, Hp)),
        compiler_params=pltpu.CompilerParams(
            dimension_semantics=("parallel",),
            vmem_limit_bytes=_VMEM_LIMIT),
    )(y_rows, seq_krh, p_rows, mu_rows, norm_rows,
      packed['D2'], packed['state_all'], packed['Wmix'], packed['bmix'],
      packed['IDFT'])


# ----------------------------------------------------------------------------
# JAX glue (leader gather/shift, softmax over r, mixture weights)
# ----------------------------------------------------------------------------
def shifted_leader_seq(xn, y_hat, leader_ids, shift):
    """seq_shifted[b,c,k,t] = leader forecast shifted by `shift`, back-filled
    with the leader's recent (normalized) history.
    # TODO(synk): pull this data-dependent cross-channel gather into the refine
    # kernel via PrefetchScalarGridSpec + per-row DMA to avoid the HBM tensor.
    """
    B, C, L = xn.shape
    H = y_hat.shape[-1]
    combined = jnp.concatenate([xn, y_hat], axis=-1)                     # [B,C,L+H]
    lead_seq = combined[jnp.arange(B)[:, None, None], leader_ids]        # [B,C,K,L+H]
    t_idx = (L - shift)[..., None] + jnp.arange(H)[None, None, None, :]  # [B,C,K,H]
    t_idx = jnp.clip(t_idx, 0, L + H - 1)      # guard shifts outside [0, L]
    return jnp.take_along_axis(lead_seq, t_idx, axis=-1)


def dft_matrices(H):
    F = H // 2 + 1
    n = jnp.arange(H, dtype=jnp.float32)[:, None]
    k = jnp.arange(F, dtype=jnp.float32)[None, :]
    ang = 2.0 * math.pi * n * k / H                    # [H, F]
    DC = jnp.cos(ang)
    DS = jnp.sin(ang)
    w = jnp.full((F,), 2.0, jnp.float32).at[0].set(1.0)
    if H % 2 == 0:
        w = w.at[F - 1].set(1.0)
    IC = (w[:, None] * jnp.cos(ang.T)) / H             # [F, H]
    IS = (-w[:, None] * jnp.sin(ang.T)) / H
    return DC, DS, IC, IS


def init_params(key, L, H, C, K, S, temperature=1.0):
    """Logical (unpadded) parameters, matching the PyTorch module."""
    F = H // 2 + 1
    ks = jax.random.split(key, 8)
    Wt = jax.random.normal(ks[0], (L, H), jnp.float32) * (1.0 / math.sqrt(L))
    b = jax.random.normal(ks[1], (1, H), jnp.float32) * 0.01
    Wp = jax.random.normal(ks[2], (K, S), jnp.float32) * 0.5
    bp = jax.random.normal(ks[3], (S,), jnp.float32) * 0.01
    state_re = jax.random.normal(ks[4], (S, (2 * K + 1) * F), jnp.float32) * 0.1
    state_im = jax.random.normal(ks[5], (S, (2 * K + 1) * F), jnp.float32) * 0.1
    Wre = jax.random.normal(ks[6], (3 * F, F), jnp.float32) * (1.0 / math.sqrt(3 * F))
    Wim = jax.random.normal(ks[7], (3 * F, F), jnp.float32) * (1.0 / math.sqrt(3 * F))
    bre = jnp.zeros((1, F), jnp.float32)
    bim = jnp.zeros((1, F), jnp.float32)
    return dict(Wt=Wt, b=b, Wp=Wp, bp=bp, state_re=state_re, state_im=state_im,
                Wre=Wre, Wim=Wim, bre=bre, bim=bim, temperature=temperature)


def pack_params(params, L, H, K, S, mxu_dtype=MXU_DTYPE):
    """Pad / fuse weights for the Pallas kernels (zero padding keeps the math
    exact; padded frequency bins and padded time steps contribute nothing)."""
    F = H // 2 + 1
    Hp = _round_up(H, LANE)
    Fp = _round_up(F, LANE)
    Sp = _round_up(S, SUBLANE)

    Wt = jnp.zeros((L, Hp), jnp.float32).at[:, :H].set(params['Wt'])
    b = jnp.zeros((1, Hp), jnp.float32).at[:, :H].set(params['b'])

    DC, DS, IC, IS = dft_matrices(H)
    D2 = jnp.zeros((Hp, 2 * Fp), jnp.float32)
    D2 = D2.at[:H, :F].set(DC).at[:H, Fp:Fp + F].set(-DS)
    IDFT = jnp.zeros((2 * Fp, Hp), jnp.float32)
    IDFT = IDFT.at[:F, :H].set(IC).at[Fp:Fp + F, :H].set(IS)

    # filter-state table [Sp, (2K+1)*2Fp]; per filter slot the layout is [re|im]
    st_re = params['state_re'].reshape(S, 2 * K + 1, F)
    st_im = params['state_im'].reshape(S, 2 * K + 1, F)
    state_all = jnp.zeros((Sp, (2 * K + 1) * 2 * Fp), jnp.float32)
    for slot in range(2 * K + 1):
        o = slot * 2 * Fp
        state_all = state_all.at[:S, o:o + F].set(st_re[:, slot])
        state_all = state_all.at[:S, o + Fp:o + Fp + F].set(st_im[:, slot])

    # complex mix layer fused to [3Fp, 2Fp]: columns [real-out | imag-out]
    Wmix = jnp.zeros((3 * Fp, 2 * Fp), jnp.float32)
    for j in range(3):
        Wmix = Wmix.at[j * Fp:j * Fp + F, :F].set(params['Wre'][j * F:(j + 1) * F])
        Wmix = Wmix.at[j * Fp:j * Fp + F, Fp:Fp + F].set(params['Wim'][j * F:(j + 1) * F])
    bmix = jnp.zeros((1, 2 * Fp), jnp.float32)
    bmix = bmix.at[:, :F].set(params['bre']).at[:, Fp:Fp + F].set(params['bim'])

    return dict(Wt=Wt, b=b,
                D2=D2.astype(mxu_dtype), IDFT=IDFT.astype(mxu_dtype),
                state_all=state_all.astype(mxu_dtype),
                Wmix=Wmix.astype(mxu_dtype), bmix=bmix,
                H=H, F=F, Hp=Hp, Fp=Fp, S=S, Sp=Sp, K=K, L=L)


def light_mts_forward(params, packed, x_bln, leader_ids, shift, r):
    """x_bln: [B, seq_len, enc_in]  ->  returns [B, pred_len, enc_in]"""
    x = jnp.transpose(x_bln, (0, 2, 1)).astype(jnp.float32)      # [B, C, L]
    B, C, L = x.shape
    H, Hp, Fp, S, Sp = packed['H'], packed['Hp'], packed['Fp'], packed['S'], packed['Sp']
    K = leader_ids.shape[-1]

    R = B * C
    per_row_bytes = 4 * ((K + 2) * Hp + (6 * K + 10) * Fp)   # blocks + live temps
    tr = _choose_row_tile(R, per_row_bytes)
    Rp = _round_up(R, tr)

    # ---- kernel 1: instance norm + backbone linear --------------------------
    x_rows = jnp.pad(x.reshape(R, L), ((0, Rp - R), (0, 0)))
    xn_rows, mu_rows, norm_rows, y_rows = run_backbone(
        x_rows, packed['Wt'], packed['b'], tr)

    xn = xn_rows[:R].reshape(B, C, L)
    y_hat = y_rows[:R, :H].reshape(B, C, H)

    # ---- LeadRefiner glue ----------------------------------------------------
    # TODO(synk): fusing kernels 1 & 2 requires the cross-channel leader gather
    # inside the kernel; kept as two pallas_calls with the gather in XLA.
    seq_shifted = shifted_leader_seq(xn, y_hat, leader_ids, shift)   # [B,C,K,H]

    r_cat = jnp.concatenate([jnp.ones((B, C, 1), jnp.float32), jnp.abs(r)], axis=-1)
    r_soft = jax.nn.softmax(r_cat / params['temperature'], axis=-1)
    # TODO(synk): LIFT's FilterFactory source is not provided; reconstructed as a
    # soft mixture over `state_num` learned complex filter banks (mixture weights
    # computed here, filter synthesis done inside the Pallas refine kernel).
    logits = jnp.einsum('bck,ks->bcs', r_soft[..., 1:], params['Wp']) + params['bp']
    p = jax.nn.softmax(logits, axis=-1)                              # [B, C, S]

    # pack activations for kernel 2: rows = B*C on sublanes, time lane-padded
    seq_krh = jnp.transpose(seq_shifted, (2, 0, 1, 3)).reshape(K, R, H)
    seq_krh = jnp.pad(seq_krh, ((0, 0), (0, Rp - R), (0, Hp - H)))
    p_rows = jnp.pad(p.reshape(R, S), ((0, Rp - R), (0, Sp - S)))

    # ---- kernel 2: in-kernel filters + rfft / filter / mix / irfft + de-norm -
    out_rows = run_refine(y_rows, seq_krh, p_rows, mu_rows, norm_rows, packed, tr)
    out = out_rows[:R, :H].reshape(B, C, H)
    return jnp.transpose(out, (0, 2, 1))                             # [B, H, N]


if __name__ == "__main__":
    # configs: seq_len=16, pred_len=8, enc_in=4, in_dim=1, leader_num=2, state_num=4
    B, L, H, N, K, S = 2, 16, 8, 4, 2, 4
    C = N  # enc_in * in_dim

    key = jax.random.PRNGKey(0)
    kx, kr, kp = jax.random.split(key, 3)
    x = jax.random.normal(kx, (B, L, N), jnp.float32)

    leader_ids = (jnp.arange(C)[None, :, None] + 1 + jnp.arange(K)[None, None, :]) % C
    leader_ids = jnp.broadcast_to(leader_ids, (B, C, K)).astype(jnp.int32)
    shift = jnp.broadcast_to((jnp.arange(K)[None, None, :] + 1) % 4,
                             (B, C, K)).astype(jnp.int32)
    r = jax.random.normal(kr, (B, C, K), jnp.float32)

    params = init_params(kp, L, H, C, K, S, temperature=1.0)
    packed = pack_params(params, L, H, K, S)

    out = light_mts_forward(params, packed, x, leader_ids, shift, r)
    out = jax.block_until_ready(out)
    assert out.shape == (B, H, N), out.shape
    assert bool(jnp.all(jnp.isfinite(out)))
    print("KERNEL_OK")
</pallas_src>

<mosaic_0001>
module attributes {stable_mosaic.version = 11 : i64} {
  func.func @backbone_kernel(%arg0: i32, %arg1: memref<8x16xf32, #tpu.memory_space<vmem>>, %arg2: memref<16x128xf32, #tpu.memory_space<vmem>>, %arg3: memref<1x128xf32, #tpu.memory_space<vmem>>, %arg4: memref<8x16xf32, #tpu.memory_space<vmem>>, %arg5: memref<8x1xf32, #tpu.memory_space<vmem>>, %arg6: memref<8x1xf32, #tpu.memory_space<vmem>>, %arg7: memref<8x128xf32, #tpu.memory_space<vmem>>) attributes {dimension_semantics = [#tpu.dimension_semantics<parallel>], iteration_bounds = array<i64: 1>, scalar_prefetch = 0 : i64, scratch_operands = 0 : i64, tpu.core_type = #tpu.core_type<tc>, window_params = [{transform_indices = @transform_0, window_bounds = array<i64: 8, 16>}, {pipeline_mode = #tpu.pipeline_mode<synchronous>, transform_indices = @transform_1, window_bounds = array<i64: 16, 128>}, {pipeline_mode = #tpu.pipeline_mode<synchronous>, transform_indices = @transform_2, window_bounds = array<i64: 1, 128>}, {transform_indices = @transform_3, window_bounds = array<i64: 8, 16>}, {transform_indices = @transform_4, window_bounds = array<i64: 8, 1>}, {transform_indices = @transform_5, window_bounds = array<i64: 8, 1>}, {transform_indices = @transform_6, window_bounds = array<i64: 8, 128>}]} {
    %c0 = arith.constant 0 : index
    %c0_0 = arith.constant 0 : index
    %0 = vector.load %arg1[%c0, %c0_0] : memref<8x16xf32, #tpu.memory_space<vmem>>, vector<8x16xf32>
    %cst = arith.constant dense<0.000000e+00> : vector<8xf32>
    %1 = vector.multi_reduction <add>, %0, %cst [1] : vector<8x16xf32> to vector<8xf32>
    %2 = vector.shape_cast %1 : vector<8xf32> to vector<8x1xf32>
    %cst_1 = arith.constant 1.600000e+01 : f32
    %3 = vector.broadcast %cst_1 : f32 to vector<8x1xf32>
    %4 = arith.divf %2, %3 : vector<8x1xf32>
    %5 = vector.broadcast %4 : vector<8x1xf32> to vector<8x16xf32>
    %6 = arith.subf %0, %5 : vector<8x16xf32>
    %7 = arith.mulf %6, %6 : vector<8x16xf32>
    %cst_2 = arith.constant dense<0.000000e+00> : vector<8xf32>
    %8 = vector.multi_reduction <add>, %7, %cst_2 [1] : vector<8x16xf32> to vector<8xf32>
    %9 = vector.shape_cast %8 : vector<8xf32> to vector<8x1xf32>
    %cst_3 = arith.constant 1.500000e+01 : f32
    %10 = vector.broadcast %cst_3 : f32 to vector<8x1xf32>
    %11 = arith.divf %9, %10 : vector<8x1xf32>
    %12 = math.sqrt %11 : vector<8x1xf32>
    %cst_4 = arith.constant 9.99999993E-9 : f32
    %13 = vector.broadcast %cst_4 : f32 to vector<8x1xf32>
    %14 = arith.addf %12, %13 : vector<8x1xf32>
    %15 = vector.broadcast %14 : vector<8x1xf32> to vector<8x16xf32>
    %16 = arith.divf %6, %15 : vector<8x16xf32>
    %c0_5 = arith.constant 0 : index
    %c0_6 = arith.constant 0 : index
    %17 = vector.load %arg4[%c0_5, %c0_6] : memref<8x16xf32, #tpu.memory_space<vmem>>, vector<8x16xf32>
    tpu.vector_store %arg4[%c0_5, %c0_6], %16 {strides = array<i32>} : memref<8x16xf32, #tpu.memory_space<vmem>>, vector<8x16xf32>,
    %c0_7 = arith.constant 0 : index
    %c0_8 = arith.constant 0 : index
    %18 = vector.load %arg5[%c0_7, %c0_8] : memref<8x1xf32, #tpu.memory_space<vmem>>, vector<8x1xf32>
    tpu.vector_store %arg5[%c0_7, %c0_8], %4 {strides = array<i32>} : memref<8x1xf32, #tpu.memory_space<vmem>>, vector<8x1xf32>,
    %c0_9 = arith.constant 0 : index
    %c0_10 = arith.constant 0 : index
    %19 = vector.load %arg6[%c0_9, %c0_10] : memref<8x1xf32, #tpu.memory_space<vmem>>, vector<8x1xf32>
    tpu.vector_store %arg6[%c0_9, %c0_10], %14 {strides = array<i32>} : memref<8x1xf32, #tpu.memory_space<vmem>>, vector<8x1xf32>,
    %c0_11 = arith.constant 0 : index
    %c0_12 = arith.constant 0 : index
    %20 = vector.load %arg2[%c0_11, %c0_12] : memref<16x128xf32, #tpu.memory_space<vmem>>, vector<16x128xf32>
    %cst_13 = arith.constant dense<0.000000e+00> : vector<8x128xf32>
    %21 = tpu.matmul %16, %20, %cst_13 {dimension_numbers = #tpu.dot_dimension_numbers<[1], [0], [0], [1], [0, 0, 1, 1], [], []>} : vector<8x16xf32>, vector<16x128xf32>, vector<8x128xf32> -> vector<8x128xf32>
    %c0_14 = arith.constant 0 : index
    %c0_15 = arith.constant 0 : index
    %22 = vector.load %arg3[%c0_14, %c0_15] : memref<1x128xf32, #tpu.memory_space<vmem>>, vector<1x128xf32>
    %23 = vector.broadcast %22 : vector<1x128xf32> to vector<8x128xf32>
    %24 = arith.addf %21, %23 : vector<8x128xf32>
    %c0_16 = arith.constant 0 : index
    %c0_17 = arith.constant 0 : index
    %25 = vector.load %arg7[%c0_16, %c0_17] : memref<8x128xf32, #tpu.memory_space<vmem>>, vector<8x128xf32>
    tpu.vector_store %arg7[%c0_16, %c0_17], %24 {strides = array<i32>} : memref<8x128xf32, #tpu.memory_space<vmem>>, vector<8x128xf32>,
    return
  }
  func.func @transform_0(%arg0: i32) -> (i32, i32) {
    %c0_i32 = arith.constant 0 : i32
    %c0_i32_0 = arith.constant 0 : i32
    return %arg0, %c0_i32 : i32, i32
  }
  func.func @transform_1(%arg0: i32) -> (i32, i32) {
    %c0_i32 = arith.constant 0 : i32
    %c0_i32_0 = arith.constant 0 : i32
    %c0_i32_1 = arith.constant 0 : i32
    return %c0_i32, %c0_i32_0 : i32, i32
  }
  func.func @transform_2(%arg0: i32) -> (i32, i32) {
    %c0_i32 = arith.constant 0 : i32
    %c0_i32_0 = arith.constant 0 : i32
    %c0_i32_1 = arith.constant 0 : i32
    return %c0_i32, %c0_i32_0 : i32, i32
  }
  func.func @transform_3(%arg0: i32) -> (i32, i32) {
    %c0_i32 = arith.constant 0 : i32
    %c0_i32_0 = arith.constant 0 : i32
    return %arg0, %c0_i32 : i32, i32
  }
  func.func @transform_4(%arg0: i32) -> (i32, i32) {
    %c0_i32 = arith.constant 0 : i32
    %c0_i32_0 = arith.constant 0 : i32
    return %arg0, %c0_i32 : i32, i32
  }
  func.func @transform_5(%arg0: i32) -> (i32, i32) {
    %c0_i32 = arith.constant 0 : i32
    %c0_i32_0 = arith.constant 0 : i32
    return %arg0, %c0_i32 : i32, i32
  }
  func.func @transform_6(%arg0: i32) -> (i32, i32) {
    %c0_i32 = arith.constant 0 : i32
    %c0_i32_0 = arith.constant 0 : i32
    return %arg0, %c0_i32 : i32, i32
  }
}

</mosaic_0001>

<bundles_post_ra>
// kernel: tpu_custom_call.1
= control target key start
LH: loop header
LB: loop body
LE: loop exit
PB: predicated region body
PF: predicated region fallthrough
CT: control target
= control target key end

     0   :  { %12 = vsyncpa [#allocation3], 0  ;;  %s377_s0 = inlined_call_operand.hbm [shape: f32[8,16], index: 0, kind: input, shape index: {}]   ;;  %s378_s1 = inlined_call_operand.hbm [shape: f32[16,128], index: 1, kind: input, shape index: {}]   ;;  %s379_s2 = inlined_call_operand.vmem [shape: f32[1,128], index: 2, kind: input, shape index: {}]   ;;  %s380_s3 = inlined_call_operand.hbm [shape: f32[8,16], index: 3, kind: output, shape index: {0}]   ;;  %s381_s4 = inlined_call_operand.vmem [shape: f32[8,1], index: 4, kind: output, shape index: {1}]   ;;  %s382_s5 = inlined_call_operand.vmem [shape: f32[8,1], index: 5, kind: output, shape index: {2}]   ;;  %s383_s6 = inlined_call_operand.hbm [shape: f32[8,128], index: 6, kind: output, shape index: {3}]  }
   0x1   :  { %13 = vsyncpa [#allocation6], 0 }
   0x2   :  { %14 = vsyncpa [#allocation4], 0 }
   0x3   :  { %15 = vsyncpa [#allocation9], 0  ;;  %s307_s21 = smov [#allocation2]   ;;  %s308_s23 = smov [#allocation5]  }
   0x4   :  { %s22_s22 = sshll.u32 %s307_s21, 4  ;;  %s31_s24 = sshll.u32 %s308_s23, 4  ;;  %s23_s22 = int_to_ptr.vmem [resolvable:$true] %s22_s22  ;;  %s32_s24 = int_to_ptr.vmem [resolvable:$true] %s31_s24 }
   0x5   :  { %s227_s25 = scalar_lea.vmem %s23_s22, 128  ;;  %p232_p1 = scmp.lt.s32.totalorder %s23_s22, %s23_s22 }
   0x6   :  { %p228_p0 = scmp.ne.s32.totalorder %s23_s22, %s227_s25  ;;  %p233_p2 = scmp.lt.s32.totalorder %s227_s25, %s227_s25 }
   0x8   :  { %p234_p3 = por %p233_p2, %p232_p1 }
   0xa   :  { %p235_p4 = pnand %p234_p3, %p228_p0 }
   0xc   :  { %238 = shalt.err (!%p235_p4)
}
   0xd   :  { %25 = dma.hbm_to_vmem [thread:$0]  %s377_s0, 128, %s23_s22, [#allocation3]  }
   0xe   :  { %s247_s28 = scalar_lea.vmem %s32_s24, 256  ;;  %p252_p6 = scmp.lt.s32.totalorder %s32_s24, %s32_s24 }
   0xf   :  { %p248_p5 = scmp.ne.s32.totalorder %s32_s24, %s247_s28  ;;  %p253_p7 = scmp.lt.s32.totalorder %s247_s28, %s247_s28 }
  0x11   :  { %p254_p8 = por %p253_p7, %p252_p6 }
  0x13   :  { %p255_p9 = pnand %p254_p8, %p248_p5 }
  0x15   :  { %258 = shalt.err (!%p255_p9)
}
  0x16   :  { %s309_s29 = smov 128   ;;  %s310_s30 = smov 8  }
  0x17   :  { %37 = dma.hbm_to_vmem [thread:$0]  %s378_s1, 256, %s32_s24, [#allocation6], %s309_s29, %s309_s29, %s310_s30  }
  0x18   :  { %299 = dma.done.wait [#allocation3], 128  }
  0x19   :  { %300 = vsyncadd [#allocation3], 4294967168 }
  0x1a   :  { %301 = dma.done.wait [#allocation6], 256  }
  0x1b   :  { %302 = vsyncadd [#allocation6], 4294967040  ;;  %vm47_vm0 = vcmask 130048   ;;  %v46_v0 = vld [vmem:[#allocation2] sm:$0xff]  ;;  %vm71_vm1 = vcmask 7168   ;;  %v75_v7 = vld [vmem:[#allocation5 + $0x8] sm:$0xff] }
  0x1c   :  { %v48_v1 = vsel %vm47_vm0, %v46_v0, 0.0  ;;  %v311_v8 = vmov 0.0   ;;  %v74_v9 = vld [vmem:[#allocation5] sm:$0xff]  ;;  %vm312_vm2 = vmmov 0   ;;  %s313_s10 = smov [#allocation7]  }
  0x1d   :  { %49 = vadd.xlane.f32.xlu0 %v48_v1  ;;  %200 = vmatprep.subr.mxu0 %v311_v8  ;;  %s163_s11 = sshll.u32 %s313_s10, 4  ;;  %s164_s11 = int_to_ptr.vmem [resolvable:$true] %s163_s11 }
  0x1e   :  { %204 = vmatprep.mubr.msk.f32.mxu0 %vm312_vm2, %v311_v8  ;;  %201 = vmatpush3.msra.mxu0 %v75_v7  ;;  %s259_s12 = scalar_lea.vmem %s164_s11, 128  ;;  %p264_p11 = scmp.lt.s32.totalorder %s164_s11, %s164_s11 }
  0x1f   :  { %202 = vmatprep.subr.mxu0 %v311_v8  ;;  %p260_p10 = scmp.ne.s32.totalorder %s164_s11, %s259_s12  ;;  %p265_p12 = scmp.lt.s32.totalorder %s259_s12, %s259_s12 }
  0x20   :  { %203 = vmatpush3.msra.mxu0 %v74_v9 }
  0x21   :  { %p266_p13 = por %p265_p12, %p264_p11 }
  0x23   :  { %p267_p0 = pnand %p266_p13, %p260_p10 }
  0xa6   :  { %v50_v2 = vpop.xlane.xlu0 %49 }
  0xa7   :  { %v52_v3 = vmul.f32 0.0625, %v50_v2 }
  0xa9   :  { %v53_v4 = vsub.f32 %v46_v0, %v52_v3  ;;  %72 = vst.msk [vmem:[%s381_s4] sm:$0xff] %vm71_vm1, %v52_v3 }
  0xab   :  { %v54_v5 = vmul.f32 %v53_v4, %v53_v4 }
  0xad   :  { %v55_v6 = vsel %vm47_vm0, %v54_v5, 0.0 }
  0xae   :  { %56 = vadd.xlane.f32.xlu0 %v55_v6 }
 0x137   :  { %v57_v10 = vpop.xlane.xlu0 %56 }
 0x138   :  { %v59_v11 = vmul.f32 0.06666667, %v57_v10 }
 0x13a   :  { %215 = vrsqrt.f32 %v59_v11  ;;  %vm62_vm3 = vcmp.eq.f32.partialorder %v59_v11, inf  ;;  %v65_v14 = vand.u32 2147483648, %v59_v11  ;;  %vm64_vm4 = vcmp.eq.f32.partialorder %v59_v11, 0.0 }
 0x147   :  { %v216_v12 = vpop.eup %215 }
 0x148   :  { %v61_v13 = vmul.f32 %v216_v12, %v59_v11 }
 0x14a   :  { %v63_v15 = vsel %vm62_vm3, %v59_v11, %v61_v13 }
 0x14b   :  { %v66_v16 = vsel %vm64_vm4, %v65_v14, %v63_v15 }
 0x14c   :  { %v67_v17 = vadd.f32 1e-08, %v66_v16 }
 0x14e   :  { %73 = vst.msk [vmem:[%s382_s5] sm:$0xff] %vm71_vm1, %v67_v17  ;;  %217 = vrcp.f32 %v67_v17 }
 0x15b   :  { %v218_v18 = vpop.eup %217 }
 0x15c   :  { %v69_v19 = vmul.f32 %v218_v18, %v53_v4 }
 0x15e   :  { %205 = vmatmul.mubr.msk.f32.vlgmr.msra.gmra.mxu0 %vm47_vm0, %v69_v19  ;;  %70 = vst.msk [vmem:[#allocation7] sm:$0xff] %vm47_vm0, %v69_v19 }
 0x15f   :  { %270 = shalt.err (!%p267_p0)
}
 0x160   :  { %166 = dma.vmem_to_hbm [thread:$0]  %s164_s11, 128, %s380_s3, [#allocation4]   ;;  %v195_v20 = vld [vmem:[%s379_s2] ss:$0 sm:$0xff] }
 0x161   :  { %s314_s16 = smov [#allocation8]  }
 0x162   :  { %s177_s17 = sshll.u32 %s314_s16, 4  ;;  %s178_s17 = int_to_ptr.vmem [resolvable:$true] %s177_s17 }
 0x163   :  { %s279_s18 = scalar_lea.vmem %s178_s17, 128  ;;  %p284_p2 = scmp.lt.s32.totalorder %s178_s17, %s178_s17 }
 0x164   :  { %p280_p1 = scmp.ne.s32.totalorder %s178_s17, %s279_s18  ;;  %p285_p3 = scmp.lt.s32.totalorder %s279_s18, %s279_s18 }
 0x166   :  { %p286_p4 = por %p285_p3, %p284_p2 }
 0x168   :  { %p287_p5 = pnand %p286_p4, %p280_p1 }
 0x21e   :  { %v152_v21 = vpop.f32.mrf.mxu0 }
 0x21f   :  { %v153_v22 = vadd.f32 %v195_v20, %v152_v21 }
 0x220   :  { %v206_v23 = vpop.f32.mrf.mxu0 }
 0x221   :  { %156 = vst [vmem:[#allocation8] sm:$0xff] %v153_v22 }
 0x222   :  { %290 = shalt.err (!%p287_p5)
}
 0x223   :  { %180 = dma.vmem_to_hbm [thread:$0]  %s178_s17, 128, %s383_s6, [#allocation9]  }
 0x224   :  { %303 = dma.done.wait [#allocation4], 128  }
 0x225   :  { %304 = vsyncadd [#allocation4], 4294967168 }
 0x226   :  { %305 = dma.done.wait [#allocation9], 128  }
 0x227   :  { %306 = vsyncadd [#allocation9], 4294967168 }
 0x228   :  { %191 = vsyncpa [#allocation3], 1 }
 0x229   :  { %192 = vsyncpa [#allocation6], 1 }
 0x22a   :  { %193 = vsyncpa [#allocation4], 1 }
 0x22b   :  { %194 = vsyncpa [#allocation9], 1 }

</bundles_post_ra>
